<compile_context>
chip_gen: v7x
topology: tpu7x:2x2x1
jax: 0.10.0
libtpu: 0.0.40
codegen_flags: <defaults>
</compile_context>

<pallas_src>
import functools
import numpy as np
import jax
import jax.numpy as jnp
from jax import lax
from jax.experimental import pallas as pl
from jax.experimental.pallas import tpu as pltpu


def _row_tile(m):
    # Full slab if it is small, otherwise 512-row tiles (multiple of 8 sublanes);
    # the last partial block is handled by Pallas bounds masking.
    return m if m <= 512 else 512


# ---------------------------------------------------------------------------
# Kernel 1: row-tiled matmul (no bias) — Q / K / V projections.
#   x: (TM, K), w: (K, N) -> out: (TM, N)
# ---------------------------------------------------------------------------
def _proj_kernel(x_ref, w_ref, o_ref):
    o_ref[...] = jnp.dot(x_ref[...], w_ref[...],
                         preferred_element_type=jnp.float32).astype(o_ref.dtype)


def _project(x, w):
    M, K = x.shape
    N = w.shape[1]
    tm = _row_tile(M)
    return pl.pallas_call(
        _proj_kernel,
        out_shape=jax.ShapeDtypeStruct((M, N), jnp.float32),
        grid_spec=pltpu.PrefetchScalarGridSpec(
            num_scalar_prefetch=0,
            grid=(pl.cdiv(M, tm),),
            in_specs=[
                pl.BlockSpec((tm, K), lambda i: (i, 0)),
                pl.BlockSpec((K, N), lambda i: (0, 0)),   # weight resident in VMEM
            ],
            out_specs=pl.BlockSpec((tm, N), lambda i: (i, 0)),
        ),
        compiler_params=pltpu.CompilerParams(
            dimension_semantics=("parallel",)),
    )(x, w)


# ---------------------------------------------------------------------------
# Kernel 2: scaled-dot-product attention, one (head, batch) per grid step.
#   q: (Lq, d_k), k: (Lk, d_k), v: (Lk, d_v), mask: (Lq, Lk) in {0,1}
#   -> out: (Lq, d_v), attn: (Lq, Lk)
# ---------------------------------------------------------------------------
def _attn_kernel(q_ref, k_ref, v_ref, m_ref, o_ref, a_ref, *, inv_temp):
    q = q_ref[...]
    k = k_ref[...]
    v = v_ref[...]
    msk = m_ref[...]                     # 1.0 => masked position

    # scores = (q @ k^T) / temperature   (contract over d_k, rhs transposed)
    s = lax.dot_general(q, k, (((1,), (1,)), ((), ())),
                        preferred_element_type=jnp.float32) * inv_temp
    s = jnp.where(msk > 0.5, jnp.float32(-1e10), s)

    m = jnp.max(s, axis=-1, keepdims=True)
    p = jnp.exp(s - m)
    l = jnp.sum(p, axis=-1, keepdims=True)
    attn = p / l

    a_ref[...] = attn
    o_ref[...] = jnp.dot(attn, v, preferred_element_type=jnp.float32)


def _attention(Qh, Kh, Vh, mask_f, *, inv_temp):
    BH, Lq, d_k = Qh.shape
    Lk = Kh.shape[1]
    d_v = Vh.shape[2]

    kernel = functools.partial(_attn_kernel, inv_temp=inv_temp)
    flops = 2 * BH * Lq * Lk * (d_k + d_v)
    bytes_accessed = 4 * (Qh.size + Kh.size + Vh.size + mask_f.size
                          + BH * Lq * d_v + BH * Lq * Lk)

    out, attn = pl.pallas_call(
        kernel,
        out_shape=(jax.ShapeDtypeStruct((BH, Lq, d_v), jnp.float32),
                   jax.ShapeDtypeStruct((BH, Lq, Lk), jnp.float32)),
        grid_spec=pltpu.PrefetchScalarGridSpec(
            num_scalar_prefetch=0,
            grid=(BH,),
            in_specs=[
                pl.BlockSpec((None, Lq, d_k), lambda i: (i, 0, 0)),
                pl.BlockSpec((None, Lk, d_k), lambda i: (i, 0, 0)),
                pl.BlockSpec((None, Lk, d_v), lambda i: (i, 0, 0)),
                pl.BlockSpec((None, Lq, Lk), lambda i: (i, 0, 0)),
            ],
            out_specs=[
                pl.BlockSpec((None, Lq, d_v), lambda i: (i, 0, 0)),
                pl.BlockSpec((None, Lq, Lk), lambda i: (i, 0, 0)),
            ],
        ),
        compiler_params=pltpu.CompilerParams(
            dimension_semantics=("parallel",)),
        cost_estimate=pl.CostEstimate(flops=flops,
                                      transcendentals=BH * Lq * Lk,
                                      bytes_accessed=bytes_accessed),
    )(Qh, Kh, Vh, mask_f)
    return out, attn


# ---------------------------------------------------------------------------
# Kernel 3: fused fc + bias + residual + LayerNorm epilogue, row-tiled.
#   x: (TM, H*d_v), w: (H*d_v, d_model), b/gamma/beta: (1, d_model),
#   res: (TM, d_model) -> out: (TM, d_model)
# ---------------------------------------------------------------------------
def _out_kernel(x_ref, w_ref, b_ref, res_ref, g_ref, beta_ref, o_ref, *, eps):
    y = jnp.dot(x_ref[...], w_ref[...], preferred_element_type=jnp.float32)
    y = y + b_ref[...] + res_ref[...]
    mu = jnp.mean(y, axis=-1, keepdims=True)
    var = jnp.mean(jnp.square(y - mu), axis=-1, keepdims=True)
    yhat = (y - mu) * lax.rsqrt(var + eps)
    o_ref[...] = yhat * g_ref[...] + beta_ref[...]


def _fc_residual_layernorm(x, w_fc, b_fc, residual, gamma, beta, *, eps):
    M, Kd = x.shape
    d_model = w_fc.shape[1]
    tm = _row_tile(M)
    kernel = functools.partial(_out_kernel, eps=eps)
    return pl.pallas_call(
        kernel,
        out_shape=jax.ShapeDtypeStruct((M, d_model), jnp.float32),
        grid_spec=pltpu.PrefetchScalarGridSpec(
            num_scalar_prefetch=0,
            grid=(pl.cdiv(M, tm),),
            in_specs=[
                pl.BlockSpec((tm, Kd), lambda i: (i, 0)),
                pl.BlockSpec((Kd, d_model), lambda i: (0, 0)),
                pl.BlockSpec((1, d_model), lambda i: (0, 0)),
                pl.BlockSpec((tm, d_model), lambda i: (i, 0)),
                pl.BlockSpec((1, d_model), lambda i: (0, 0)),
                pl.BlockSpec((1, d_model), lambda i: (0, 0)),
            ],
            out_specs=pl.BlockSpec((tm, d_model), lambda i: (i, 0)),
        ),
        compiler_params=pltpu.CompilerParams(
            dimension_semantics=("parallel",)),
    )(x, w_fc, b_fc.reshape(1, d_model), residual,
      gamma.reshape(1, d_model), beta.reshape(1, d_model))


# ---------------------------------------------------------------------------
# Full forward (mirrors MultiHeadAttention.forward, dropout == identity)
# ---------------------------------------------------------------------------
def multi_head_attention(q, k, v, mask, w_qs, w_ks, w_vs, w_fc, b_fc,
                         ln_gamma, ln_beta, *, n_head, d_k, d_v, eps=1e-5):
    B, Lq, d_model = q.shape
    Lk = k.shape[1]

    qf = q.reshape(B * Lq, d_model).astype(jnp.float32)
    kf = k.reshape(B * Lk, d_model).astype(jnp.float32)
    vf = v.reshape(B * Lk, d_model).astype(jnp.float32)

    # QKV projections (weights already stored as (d_model, H*d) == torch weight^T)
    Q = _project(qf, w_qs)                                    # (B*Lq, H*d_k)
    K = _project(kf, w_ks)                                    # (B*Lk, H*d_k)
    V = _project(vf, w_vs)                                    # (B*Lk, H*d_v)

    # per-head layout (H*B, L, d) — same ordering as torch permute(2,0,1,3).view(-1,...)
    Qh = Q.reshape(B, Lq, n_head, d_k).transpose(2, 0, 1, 3).reshape(n_head * B, Lq, d_k)
    Kh = K.reshape(B, Lk, n_head, d_k).transpose(2, 0, 1, 3).reshape(n_head * B, Lk, d_k)
    Vh = V.reshape(B, Lk, n_head, d_v).transpose(2, 0, 1, 3).reshape(n_head * B, Lk, d_v)
    mask_f = jnp.tile(mask.astype(jnp.float32), (n_head, 1, 1))   # == mask.repeat(n_head,1,1)

    out_h, attn = _attention(Qh, Kh, Vh, mask_f, inv_temp=1.0 / float(np.sqrt(d_k)))

    # concat heads: (H*B, Lq, d_v) -> (B*Lq, H*d_v)  (torch permute(1,2,0,3).view)
    concat = out_h.reshape(n_head, B, Lq, d_v).transpose(1, 2, 0, 3).reshape(
        B * Lq, n_head * d_v)

    out = _fc_residual_layernorm(concat, w_fc, b_fc, qf, ln_gamma, ln_beta, eps=eps)
    return out.reshape(B, Lq, d_model), attn


if __name__ == "__main__":
    n_head, d_model, d_k, d_v = 4, 32, 8, 8
    B, L = 2, 8

    key = jax.random.PRNGKey(0)
    kq, kk, kv, km, k1, k2, k3, k4, k5, k6, k7 = jax.random.split(key, 11)

    q = jax.random.normal(kq, (B, L, d_model), dtype=jnp.float32)
    k = jax.random.normal(kk, (B, L, d_model), dtype=jnp.float32)
    v = jax.random.normal(kv, (B, L, d_model), dtype=jnp.float32)
    mask = jax.random.uniform(km, (B, L, L)) < 0.2          # True => masked out

    # Parameters (same init style as the module; stored transposed vs torch.nn.Linear)
    std_qk = float(np.sqrt(2.0 / (d_model + d_k)))
    std_v = float(np.sqrt(2.0 / (d_model + d_v)))
    w_qs = std_qk * jax.random.normal(k1, (d_model, n_head * d_k), dtype=jnp.float32)
    w_ks = std_qk * jax.random.normal(k2, (d_model, n_head * d_k), dtype=jnp.float32)
    w_vs = std_v * jax.random.normal(k3, (d_model, n_head * d_v), dtype=jnp.float32)
    w_fc = (1.0 / np.sqrt(n_head * d_v)) * jax.random.normal(
        k4, (n_head * d_v, d_model), dtype=jnp.float32)
    b_fc = 0.1 * jax.random.normal(k5, (d_model,), dtype=jnp.float32)
    ln_gamma = (jnp.ones((d_model,), dtype=jnp.float32)
                + 0.05 * jax.random.normal(k6, (d_model,), dtype=jnp.float32))
    ln_beta = 0.05 * jax.random.normal(k7, (d_model,), dtype=jnp.float32)

    out, attn = multi_head_attention(q, k, v, mask, w_qs, w_ks, w_vs, w_fc, b_fc,
                                     ln_gamma, ln_beta,
                                     n_head=n_head, d_k=d_k, d_v=d_v)
    out = jax.block_until_ready(out)
    attn = jax.block_until_ready(attn)

    # ---- pure-JAX reference (mirrors the PyTorch forward, dropout = identity) ----
    def reference(q, k, v, mask):
        Bq, Lq, _ = q.shape
        Lk = k.shape[1]
        Qr = (q.reshape(Bq * Lq, d_model) @ w_qs).reshape(Bq, Lq, n_head, d_k)
        Kr = (k.reshape(Bq * Lk, d_model) @ w_ks).reshape(Bq, Lk, n_head, d_k)
        Vr = (v.reshape(Bq * Lk, d_model) @ w_vs).reshape(Bq, Lk, n_head, d_v)
        Qh = Qr.transpose(2, 0, 1, 3).reshape(-1, Lq, d_k)
        Kh = Kr.transpose(2, 0, 1, 3).reshape(-1, Lk, d_k)
        Vh = Vr.transpose(2, 0, 1, 3).reshape(-1, Lk, d_v)
        mr = jnp.tile(mask, (n_head, 1, 1))
        s = jnp.einsum('bqd,bkd->bqk', Qh, Kh) / np.sqrt(d_k)
        s = jnp.where(mr, jnp.float32(-1e10), s)
        a = jax.nn.softmax(s, axis=-1)
        o = jnp.einsum('bqk,bkd->bqd', a, Vh)
        o = o.reshape(n_head, Bq, Lq, d_v).transpose(1, 2, 0, 3).reshape(
            Bq, Lq, n_head * d_v)
        y = o @ w_fc + b_fc + q
        mu = y.mean(-1, keepdims=True)
        var = ((y - mu) ** 2).mean(-1, keepdims=True)
        y = (y - mu) / jnp.sqrt(var + 1e-5) * ln_gamma + ln_beta
        return y, a

    ref_out, ref_attn = reference(q, k, v, mask)
    assert out.shape == (B, L, d_model)
    assert attn.shape == (n_head * B, L, L)
    np.testing.assert_allclose(np.asarray(attn), np.asarray(ref_attn),
                               rtol=2e-5, atol=2e-5)
    np.testing.assert_allclose(np.asarray(out), np.asarray(ref_out),
                               rtol=2e-5, atol=2e-5)

    print("KERNEL_OK")
</pallas_src>

<mosaic_0001>
module attributes {stable_mosaic.version = 11 : i64} {
  func.func @_proj_kernel(%arg0: i32, %arg1: memref<16x32xf32, #tpu.memory_space<vmem>>, %arg2: memref<32x32xf32, #tpu.memory_space<vmem>>, %arg3: memref<16x32xf32, #tpu.memory_space<vmem>>) attributes {dimension_semantics = [#tpu.dimension_semantics<parallel>], iteration_bounds = array<i64: 1>, scalar_prefetch = 0 : i64, scratch_operands = 0 : i64, tpu.core_type = #tpu.core_type<tc>, window_params = [{transform_indices = @transform_0, window_bounds = array<i64: 16, 32>}, {pipeline_mode = #tpu.pipeline_mode<synchronous>, transform_indices = @transform_1, window_bounds = array<i64: 32, 32>}, {transform_indices = @transform_2, window_bounds = array<i64: 16, 32>}]} {
    %c0 = arith.constant 0 : index
    %c0_0 = arith.constant 0 : index
    %0 = vector.load %arg1[%c0, %c0_0] : memref<16x32xf32, #tpu.memory_space<vmem>>, vector<16x32xf32>
    %c0_1 = arith.constant 0 : index
    %c0_2 = arith.constant 0 : index
    %1 = vector.load %arg2[%c0_1, %c0_2] : memref<32x32xf32, #tpu.memory_space<vmem>>, vector<32x32xf32>
    %cst = arith.constant dense<0.000000e+00> : vector<16x32xf32>
    %2 = tpu.matmul %0, %1, %cst {dimension_numbers = #tpu.dot_dimension_numbers<[1], [0], [0], [1], [0, 0, 1, 1], [], []>} : vector<16x32xf32>, vector<32x32xf32>, vector<16x32xf32> -> vector<16x32xf32>
    %c0_3 = arith.constant 0 : index
    %c0_4 = arith.constant 0 : index
    %3 = vector.load %arg3[%c0_3, %c0_4] : memref<16x32xf32, #tpu.memory_space<vmem>>, vector<16x32xf32>
    tpu.vector_store %arg3[%c0_3, %c0_4], %2 {strides = array<i32>} : memref<16x32xf32, #tpu.memory_space<vmem>>, vector<16x32xf32>,
    return
  }
  func.func @transform_0(%arg0: i32) -> (i32, i32) {
    %c0_i32 = arith.constant 0 : i32
    %c0_i32_0 = arith.constant 0 : i32
    return %arg0, %c0_i32 : i32, i32
  }
  func.func @transform_1(%arg0: i32) -> (i32, i32) {
    %c0_i32 = arith.constant 0 : i32
    %c0_i32_0 = arith.constant 0 : i32
    %c0_i32_1 = arith.constant 0 : i32
    return %c0_i32, %c0_i32_0 : i32, i32
  }
  func.func @transform_2(%arg0: i32) -> (i32, i32) {
    %c0_i32 = arith.constant 0 : i32
    %c0_i32_0 = arith.constant 0 : i32
    return %arg0, %c0_i32 : i32, i32
  }
}

</mosaic_0001>

<bundles_post_ra>
// kernel: tpu_custom_call.1
= control target key start
LH: loop header
LB: loop body
LE: loop exit
PB: predicated region body
PF: predicated region fallthrough
CT: control target
= control target key end

     0   :  { %7 = vsyncpa [#allocation3], 0  ;;  %s321_s0 = inlined_call_operand.hbm [shape: f32[16,32], index: 0, kind: input, shape index: {}]   ;;  %s322_s1 = inlined_call_operand.hbm [shape: f32[32,32], index: 1, kind: input, shape index: {}]   ;;  %s323_s2 = inlined_call_operand.hbm [shape: f32[16,32], index: 2, kind: output, shape index: {}]  }
   0x1   :  { %8 = vsyncpa [#allocation6], 0 }
   0x2   :  { %9 = vsyncpa [#allocation4], 0  ;;  %s252_s9 = smov [#allocation2]   ;;  %s180_s13 = scalar_lea.hbm %s321_s0, 256 }
   0x3   :  { %s15_s10 = sshll.u32 %s252_s9, 4  ;;  %p181_p0 = scmp.ne.s32.totalorder %s321_s0, %s180_s13  ;;  %s16_s10 = int_to_ptr.vmem [resolvable:$true] %s15_s10 }
   0x4   :  { %p184_p1 = scmp.lt.u32.totalorder %s180_s13, %s321_s0 }
   0x6   :  { %p186_p2 = pnand %p184_p1, %p181_p0 }
   0x8   :  { %189 = shalt.err (!%p186_p2)
}
   0x9   :  { %s190_s18 = scalar_lea.vmem %s16_s10, 256  ;;  %p195_p4 = scmp.lt.s32.totalorder %s16_s10, %s16_s10 }
   0xa   :  { %p191_p3 = scmp.ne.s32.totalorder %s16_s10, %s190_s18  ;;  %p196_p5 = scmp.lt.s32.totalorder %s190_s18, %s190_s18 }
   0xc   :  { %p197_p6 = por %p196_p5, %p195_p4 }
   0xe   :  { %p198_p7 = pnand %p197_p6, %p191_p3 }
  0x10   :  { %201 = shalt.err (!%p198_p7)
}
  0x11   :  { %s253_s19 = smov 128   ;;  %s254_s20 = smov 8  }
  0x12   :  { %21 = dma.hbm_to_vmem [thread:$0]  %s321_s0, 256, %s16_s10, [#allocation3], %s253_s19, %s253_s19, %s254_s20  }
  0x13   :  { %s255_s23 = smov [#allocation5]   ;;  %s202_s27 = scalar_lea.hbm %s322_s1, 512 }
  0x14   :  { %s27_s24 = sshll.u32 %s255_s23, 4  ;;  %p203_p8 = scmp.ne.s32.totalorder %s322_s1, %s202_s27  ;;  %s28_s24 = int_to_ptr.vmem [resolvable:$true] %s27_s24 }
  0x15   :  { %p206_p9 = scmp.lt.u32.totalorder %s202_s27, %s322_s1 }
  0x17   :  { %p208_p10 = pnand %p206_p9, %p203_p8 }
  0x19   :  { %211 = shalt.err (!%p208_p10)
}
  0x1a   :  { %s212_s4 = scalar_lea.vmem %s28_s24, 512  ;;  %p217_p12 = scmp.lt.s32.totalorder %s28_s24, %s28_s24 }
  0x1b   :  { %p213_p11 = scmp.ne.s32.totalorder %s28_s24, %s212_s4  ;;  %p218_p13 = scmp.lt.s32.totalorder %s212_s4, %s212_s4 }
  0x1d   :  { %p219_p0 = por %p218_p13, %p217_p12 }
  0x1f   :  { %p220_p1 = pnand %p219_p0, %p213_p11 }
  0x21   :  { %223 = shalt.err (!%p220_p1)
}
  0x22   :  { %33 = dma.hbm_to_vmem [thread:$0]  %s322_s1, 512, %s28_s24, [#allocation6], %s253_s19, %s253_s19, %s254_s20  }
  0x23   :  { %246 = dma.done.wait [#allocation3], 256  }
  0x24   :  { %247 = vsyncadd [#allocation3], 4294967040 }
  0x25   :  { %248 = dma.done.wait [#allocation6], 512  }
  0x26   :  { %249 = vsyncadd [#allocation6], 4294966784  ;;  %vm46_vm0 = vcmask 261120   ;;  %v42_v0 = vld [vmem:[#allocation5] sm:$0xff]  ;;  %v43_v1 = vld [vmem:[#allocation5 + $0x8] sm:$0xff]  ;;  %s256_s1 = smov [#allocation7]  }
  0x27   :  { %v44_v2 = vld [vmem:[#allocation5 + $0x10] sm:$0xff]  ;;  %v167_v3 = vpack.c.bf16 %v43_v1, %v42_v0  ;;  %v45_v4 = vld [vmem:[#allocation5 + $0x18] sm:$0xff]  ;;  %s135_s6 = sshll.u32 %s256_s1, 4  ;;  %s136_s6 = int_to_ptr.vmem [resolvable:$true] %s135_s6 }
  0x28   :  { %v40_v5 = vld [vmem:[#allocation2] sm:$0xff]  ;;  %v171_v6 = vpack.c.bf16 %v45_v4, %v44_v2  ;;  %v41_v7 = vld [vmem:[#allocation2 + $0x8] sm:$0xff]  ;;  %s224_s7 = scalar_lea.vmem %s136_s6, 256  ;;  %p229_p3 = scmp.lt.s32.totalorder %s136_s6, %s136_s6 }
  0x29   :  { %164 = vmatprep.mubr.msk.f32.mxu0 %vm46_vm0, %v40_v5  ;;  %168 = vmatprep.subr.bf16.mxu0 %v167_v3  ;;  %p225_p2 = scmp.ne.s32.totalorder %s136_s6, %s224_s7  ;;  %p230_p4 = scmp.lt.s32.totalorder %s224_s7, %s224_s7 }
  0x2a   :  { %170 = vmatpush3.bf16.msra.mxu0 %v167_v3 }
  0x2b   :  { %172 = vmatprep.subr.bf16.mxu0 %v171_v6  ;;  %p231_p5 = por %p230_p4, %p229_p3 }
  0x2d   :  { %p232_p6 = pnand %p231_p5, %p225_p2 }
  0x2e   :  { %174 = vmatpush3.bf16.msra.mxu0 %v171_v6 }
  0x31   :  { %165 = vmatmul.mubr.msk.f32.vlgmr.msra.gmra.mrb[0].mxu0 %vm46_vm0, %v41_v7 }
 0x104   :  { %v166_v8 = vpop.f32.mrb[0].mxu0 }
 0x105   :  { %129 = vst.msk [vmem:[#allocation7 + $0x8] sm:$0xff] %vm46_vm0, %v166_v8  ;;  %v119_v9 = vpop.f32.mrb[1].mxu0 }
 0x106   :  { %128 = vst.msk [vmem:[#allocation7] sm:$0xff] %vm46_vm0, %v119_v9 }
 0x107   :  { %235 = shalt.err (!%p232_p6)
}
 0x108   :  { %s236_s10 = scalar_lea.hbm %s323_s2, 256 }
 0x109   :  { %p237_p7 = scmp.ne.s32.totalorder %s323_s2, %s236_s10  ;;  %p240_p8 = scmp.lt.u32.totalorder %s236_s10, %s323_s2 }
 0x10b   :  { %p242_p9 = pnand %p240_p8, %p237_p7 }
 0x10d   :  { %245 = shalt.err (!%p242_p9)
}
 0x10e   :  { %141 = dma.vmem_to_hbm [thread:$0]  %s136_s6, 256, %s323_s2, [#allocation4], %s253_s19, %s253_s19, %s254_s20  }
 0x10f   :  { %250 = dma.done.wait [#allocation4], 256  }
 0x110   :  { %251 = vsyncadd [#allocation4], 4294967040 }
 0x111   :  { %145 = vsyncpa [#allocation3], 1 }
 0x112   :  { %146 = vsyncpa [#allocation6], 1 }
 0x113   :  { %147 = vsyncpa [#allocation4], 1 }

</bundles_post_ra>
